<compile_context>
chip_gen: v5e
topology: v5e:2x2
jax: 0.10.0
libtpu: 0.0.40
codegen_flags: <defaults>
</compile_context>

<pallas_src>
import functools
import math

import jax
import jax.numpy as jnp
from jax import lax
from jax.experimental import pallas as pl
from jax.experimental.pallas import tpu as pltpu

_MIB = 1024 * 1024

# Flattened token ids are scalar-prefetched into SMEM (1-D SMEM arrays pad to a
# power of two in bytes), so bound the per-call token count.
# TODO(synk): for larger N, block the ids into SMEM per grid step instead of
# scalar-prefetching the whole flattened vector.
_MAX_PREFETCH_IDS = 32768

_SEM_RING = 8  # power of two


def _round_up(x: int, m: int) -> int:
    return ((x + m - 1) // m) * m


def _choose_tiling(n: int, d: int, itemsize: int, *, max_tb: int,
                   buf_budget_bytes: int = 4 * _MIB):
    """Pick (tb, n_pad): tb a multiple of 8, tb*d*itemsize <= budget, tb | n_pad."""
    n_pad = _round_up(max(n, 1), 8)
    by_bytes = (buf_budget_bytes // max(d * itemsize, 1)) // 8 * 8
    limit = max(8, min(max_tb, n_pad, max(by_bytes, 8)))
    tb = 8
    for cand in range(8, limit + 1, 8):
        if n_pad % cand == 0:
            tb = cand
    if tb < min(64, limit) and n_pad > limit:
        # Awkward factorization: prefer a decent block size (fewer ~0.35us grid
        # steps) and accept a padded tail + trailing slice instead.
        tb = limit
        n_pad = _round_up(n_pad, tb)
    return tb, n_pad


def _vmem_limit_bytes(estimate: int) -> int:
    # Explicit VMEM budget (feedback: v7x has 64 MiB physical / 32 MiB default
    # scoped).  Our tiling keeps the estimate far below this clamp.
    return int(min(64 * _MIB, max(16 * _MIB, estimate + 2 * _MIB)))


# ---------------------------------------------------------------------------
# Fast path: table is VMEM-resident, gather with dynamic-offset VMEM reads.
# ---------------------------------------------------------------------------
def _vmem_table_kernel(ids_ref, tab_ref, out_ref, *, scale: float, tb: int):
    # ids_ref : (n_pad,) int32 token ids in SMEM (scalar-prefetched)
    # tab_ref : (V, D) table, VMEM-resident across the whole grid
    #           (constant index_map -> DMA'd from HBM exactly once)
    # out_ref : (tb, D) output block
    base = pl.program_id(0) * tb
    # Static store offsets (j is a Python int); the dynamic offset is only on
    # the resident-table read.  The sqrt(D) scale is fused into the copy so
    # every output element is written exactly once (no second in-place pass).
    for j in range(tb):
        tok = ids_ref[base + j]
        out_ref[pl.ds(j, 1), :] = (
            tab_ref[pl.ds(tok, 1), :] * scale
        ).astype(out_ref.dtype)


def _embed_small_table(ids, table, *, scale, tb, n_pad):
    V, D = table.shape
    itemsize = table.dtype.itemsize
    # Estimate: resident table (+ spare buffer) + double-buffered out blocks.
    est = 2 * V * D * itemsize + 2 * tb * D * itemsize
    kernel = functools.partial(_vmem_table_kernel, scale=scale, tb=tb)
    return pl.pallas_call(
        kernel,
        out_shape=jax.ShapeDtypeStruct((n_pad, D), table.dtype),
        grid_spec=pltpu.PrefetchScalarGridSpec(
            num_scalar_prefetch=1,                       # ids -> SMEM
            grid=(n_pad // tb,),
            in_specs=[
                # Whole table as one block with a constant index_map: fetched
                # from HBM once and kept resident for every grid step.
                pl.BlockSpec((V, D), lambda i, _ids: (0, 0)),
            ],
            out_specs=pl.BlockSpec((tb, D), lambda i, _ids: (i, 0)),
        ),
        compiler_params=pltpu.CompilerParams(
            dimension_semantics=("parallel",),           # shard token blocks across TCs
            vmem_limit_bytes=_vmem_limit_bytes(est),
        ),
    )(ids, table)


# ---------------------------------------------------------------------------
# Large-table path: table stays in HBM, manual DMA row gather into out_ref.
# ---------------------------------------------------------------------------
def _hbm_gather_kernel(ids_ref, tab_hbm, out_ref, sem, *, scale: float, tb: int,
                       ring: int):
    # ids_ref : (n_pad,) int32 token ids in SMEM (scalar-prefetched)
    # tab_hbm : (V, D) table left in HBM (memory_space=pl.ANY)
    # out_ref : (tb, D) output block -- rows are DMA'd straight into it
    # sem     : (ring,) DMA semaphores, reused round-robin with in-order waits
    base = pl.program_id(0) * tb

    def row_copy(j):
        # Rebuilt identically for start() and wait(): exact same (tok, j)
        # slices, no shape-only dummy descriptor.
        tok = ids_ref[base + j]
        return pltpu.make_async_copy(
            tab_hbm.at[pl.ds(tok, 1), :],
            out_ref.at[pl.ds(j, 1), :],     # gather directly into the output block
            sem.at[j & (ring - 1)],
        )

    n_fill = min(ring, tb)

    def fill(j, c):                         # prologue: fill the semaphore ring
        row_copy(j).start()
        return c

    lax.fori_loop(0, n_fill, fill, 0, unroll=True)

    if tb > ring:
        def steady(j, c):
            tok = ids_ref[base + j]         # hoist the SMEM read above the wait
            row_copy(j - ring).wait()       # retire the oldest copy on this slot
            pltpu.make_async_copy(
                tab_hbm.at[pl.ds(tok, 1), :],
                out_ref.at[pl.ds(j, 1), :],
                sem.at[j & (ring - 1)],
            ).start()
            return c

        # Partial unroll: descriptor issue is capped by the vector-misc slot,
        # so a full tb-way unroll only bloats the instruction stream.
        lax.fori_loop(ring, tb, steady, 0, unroll=4)

    def drain(j, c):
        row_copy(j).wait()
        return c

    lax.fori_loop(tb - n_fill, tb, drain, 0, unroll=4)

    # Single in-place VPU scale pass; overlaps the pipelined output writeback.
    out_ref[...] = (out_ref[...] * scale).astype(out_ref.dtype)
    # TODO(synk): deeper overlap (prefetching block i+1's rows while block i is
    # scaled / written back) needs a double-buffered VMEM staging target instead
    # of DMAing into out_ref directly; left out to keep the gather zero-copy.


def _embed_hbm_gather(ids, table, *, scale, tb, n_pad, ring=_SEM_RING):
    assert ring & (ring - 1) == 0, "semaphore ring must be a power of two"
    V, D = table.shape
    itemsize = table.dtype.itemsize
    est = 2 * tb * D * itemsize             # double-buffered output blocks
    kernel = functools.partial(_hbm_gather_kernel, scale=scale, tb=tb, ring=ring)
    return pl.pallas_call(
        kernel,
        out_shape=jax.ShapeDtypeStruct((n_pad, D), table.dtype),
        grid_spec=pltpu.PrefetchScalarGridSpec(
            num_scalar_prefetch=1,                       # ids -> SMEM
            grid=(n_pad // tb,),
            in_specs=[
                pl.BlockSpec(memory_space=pl.ANY),       # table stays in HBM
            ],
            out_specs=pl.BlockSpec((tb, D), lambda i, _ids: (i, 0)),
            scratch_shapes=[
                pltpu.SemaphoreType.DMA((ring,)),        # small reusable sem ring
            ],
        ),
        compiler_params=pltpu.CompilerParams(
            dimension_semantics=("parallel",),
            vmem_limit_bytes=_vmem_limit_bytes(est),
        ),
    )(ids, table)


# ---------------------------------------------------------------------------
# Public wrapper (matches TokenEmbedding.forward semantics).
# ---------------------------------------------------------------------------
def token_embedding(tokens: jax.Array, table: jax.Array, *,
                    max_vmem_table_bytes: int = 4 * _MIB) -> jax.Array:
    """tokens: int array (any shape); table: (V, D) -> tokens.shape + (D,)."""
    V, D = table.shape
    N = int(math.prod(tokens.shape)) if tokens.shape else 1
    itemsize = table.dtype.itemsize
    table_bytes = V * D * itemsize

    # nn.Embedding raises on out-of-range ids; clamp to keep row reads in bounds.
    # TODO(synk): surface an error for OOB ids instead of silently clamping.
    ids = jnp.clip(tokens.reshape(-1).astype(jnp.int32), 0, V - 1)

    small_table = table_bytes <= max_vmem_table_bytes
    max_tb = 128 if small_table else 512
    tb, n_pad = _choose_tiling(N, D, itemsize, max_tb=max_tb)

    if n_pad > _MAX_PREFETCH_IDS:
        raise NotImplementedError(
            f"flattened token count {N} exceeds the SMEM id-prefetch budget "
            f"({_MAX_PREFETCH_IDS}); split the call or block ids per grid step.")

    if n_pad != N:
        ids = jnp.pad(ids, (0, n_pad - N))

    scale = math.sqrt(D)
    if small_table:
        out_flat = _embed_small_table(ids, table, scale=scale, tb=tb, n_pad=n_pad)
    else:
        out_flat = _embed_hbm_gather(ids, table, scale=scale, tb=tb, n_pad=n_pad)

    if n_pad != N:                           # no-op whenever 8 | N (common case)
        out_flat = out_flat[:N]
    return out_flat.reshape(*tokens.shape, D)


if __name__ == "__main__":
    # Small, deterministic setup consistent with TokenEmbedding(vocab_size, emb_size).
    vocab_size = 64
    emb_size = 128
    batch, seq = 2, 8

    key = jax.random.PRNGKey(0)
    k_tab, k_tok = jax.random.split(key)

    # nn.Embedding default init ~ N(0, 1); deterministic synthetic weights here.
    table = jax.random.normal(k_tab, (vocab_size, emb_size), dtype=jnp.float32)
    tokens = jax.random.randint(k_tok, (batch, seq), 0, vocab_size, dtype=jnp.int32)

    out = jax.block_until_ready(token_embedding(tokens, table))

    # Reference check (plain JAX gather * sqrt(emb_size)).
    ref = jnp.take(table, tokens, axis=0) * math.sqrt(emb_size)
    assert out.shape == (batch, seq, emb_size)
    assert jnp.allclose(out, ref, atol=1e-5, rtol=1e-5)

    print("KERNEL_OK")
</pallas_src>

<mosaic_0001>
module attributes {stable_mosaic.version = 11 : i64} {
  func.func @_vmem_table_kernel(%arg0: i32, %arg1: memref<16xi32, #tpu.memory_space<smem>>, %arg2: memref<64x128xf32, #tpu.memory_space<vmem>>, %arg3: memref<16x128xf32, #tpu.memory_space<vmem>>) attributes {dimension_semantics = [#tpu.dimension_semantics<parallel>], iteration_bounds = array<i64: 1>, scalar_prefetch = 1 : i64, scratch_operands = 0 : i64, tpu.core_type = #tpu.core_type<tc>, window_params = [{pipeline_mode = #tpu.pipeline_mode<synchronous>, transform_indices = @transform_0, window_bounds = array<i64: 64, 128>}, {transform_indices = @transform_1, window_bounds = array<i64: 16, 128>}]} {
    %c16_i32 = arith.constant 16 : i32
    %0 = arith.muli %arg0, %c16_i32 : i32
    %c0_i32 = arith.constant 0 : i32
    %1 = arith.addi %0, %c0_i32 : i32
    %2 = arith.index_cast %1 : i32 to index
    %3 = memref.load %arg1[%2] : memref<16xi32, #tpu.memory_space<smem>>
    %4 = arith.index_cast %3 : i32 to index
    %c0 = arith.constant 0 : index
    %5 = vector.load %arg2[%4, %c0] : memref<64x128xf32, #tpu.memory_space<vmem>>, vector<1x128xf32>
    %cst = arith.constant 11.3137083 : f32
    %6 = vector.broadcast %cst : f32 to vector<1x128xf32>
    %7 = arith.mulf %5, %6 : vector<1x128xf32>
    %c0_0 = arith.constant 0 : index
    %c0_1 = arith.constant 0 : index
    %8 = vector.load %arg3[%c0_0, %c0_1] : memref<16x128xf32, #tpu.memory_space<vmem>>, vector<1x128xf32>
    tpu.vector_store %arg3[%c0_0, %c0_1], %7 {strides = array<i32>} : memref<16x128xf32, #tpu.memory_space<vmem>>, vector<1x128xf32>,
    %c1_i32 = arith.constant 1 : i32
    %9 = arith.addi %0, %c1_i32 : i32
    %10 = arith.index_cast %9 : i32 to index
    %11 = memref.load %arg1[%10] : memref<16xi32, #tpu.memory_space<smem>>
    %12 = arith.index_cast %11 : i32 to index
    %c0_2 = arith.constant 0 : index
    %13 = vector.load %arg2[%12, %c0_2] : memref<64x128xf32, #tpu.memory_space<vmem>>, vector<1x128xf32>
    %cst_3 = arith.constant 11.3137083 : f32
    %14 = vector.broadcast %cst_3 : f32 to vector<1x128xf32>
    %15 = arith.mulf %13, %14 : vector<1x128xf32>
    %c1 = arith.constant 1 : index
    %c0_4 = arith.constant 0 : index
    %16 = vector.load %arg3[%c1, %c0_4] : memref<16x128xf32, #tpu.memory_space<vmem>>, vector<1x128xf32>
    tpu.vector_store %arg3[%c1, %c0_4], %15 {strides = array<i32>} : memref<16x128xf32, #tpu.memory_space<vmem>>, vector<1x128xf32>,
    %c2_i32 = arith.constant 2 : i32
    %17 = arith.addi %0, %c2_i32 : i32
    %18 = arith.index_cast %17 : i32 to index
    %19 = memref.load %arg1[%18] : memref<16xi32, #tpu.memory_space<smem>>
    %20 = arith.index_cast %19 : i32 to index
    %c0_5 = arith.constant 0 : index
    %21 = vector.load %arg2[%20, %c0_5] : memref<64x128xf32, #tpu.memory_space<vmem>>, vector<1x128xf32>
    %cst_6 = arith.constant 11.3137083 : f32
    %22 = vector.broadcast %cst_6 : f32 to vector<1x128xf32>
    %23 = arith.mulf %21, %22 : vector<1x128xf32>
    %c2 = arith.constant 2 : index
    %c0_7 = arith.constant 0 : index
    %24 = vector.load %arg3[%c2, %c0_7] : memref<16x128xf32, #tpu.memory_space<vmem>>, vector<1x128xf32>
    tpu.vector_store %arg3[%c2, %c0_7], %23 {strides = array<i32>} : memref<16x128xf32, #tpu.memory_space<vmem>>, vector<1x128xf32>,
    %c3_i32 = arith.constant 3 : i32
    %25 = arith.addi %0, %c3_i32 : i32
    %26 = arith.index_cast %25 : i32 to index
    %27 = memref.load %arg1[%26] : memref<16xi32, #tpu.memory_space<smem>>
    %28 = arith.index_cast %27 : i32 to index
    %c0_8 = arith.constant 0 : index
    %29 = vector.load %arg2[%28, %c0_8] : memref<64x128xf32, #tpu.memory_space<vmem>>, vector<1x128xf32>
    %cst_9 = arith.constant 11.3137083 : f32
    %30 = vector.broadcast %cst_9 : f32 to vector<1x128xf32>
    %31 = arith.mulf %29, %30 : vector<1x128xf32>
    %c3 = arith.constant 3 : index
    %c0_10 = arith.constant 0 : index
    %32 = vector.load %arg3[%c3, %c0_10] : memref<16x128xf32, #tpu.memory_space<vmem>>, vector<1x128xf32>
    tpu.vector_store %arg3[%c3, %c0_10], %31 {strides = array<i32>} : memref<16x128xf32, #tpu.memory_space<vmem>>, vector<1x128xf32>,
    %c4_i32 = arith.constant 4 : i32
    %33 = arith.addi %0, %c4_i32 : i32
    %34 = arith.index_cast %33 : i32 to index
    %35 = memref.load %arg1[%34] : memref<16xi32, #tpu.memory_space<smem>>
    %36 = arith.index_cast %35 : i32 to index
    %c0_11 = arith.constant 0 : index
    %37 = vector.load %arg2[%36, %c0_11] : memref<64x128xf32, #tpu.memory_space<vmem>>, vector<1x128xf32>
    %cst_12 = arith.constant 11.3137083 : f32
    %38 = vector.broadcast %cst_12 : f32 to vector<1x128xf32>
    %39 = arith.mulf %37, %38 : vector<1x128xf32>
    %c4 = arith.constant 4 : index
    %c0_13 = arith.constant 0 : index
    %40 = vector.load %arg3[%c4, %c0_13] : memref<16x128xf32, #tpu.memory_space<vmem>>, vector<1x128xf32>
    tpu.vector_store %arg3[%c4, %c0_13], %39 {strides = array<i32>} : memref<16x128xf32, #tpu.memory_space<vmem>>, vector<1x128xf32>,
    %c5_i32 = arith.constant 5 : i32
    %41 = arith.addi %0, %c5_i32 : i32
    %42 = arith.index_cast %41 : i32 to index
    %43 = memref.load %arg1[%42] : memref<16xi32, #tpu.memory_space<smem>>
    %44 = arith.index_cast %43 : i32 to index
    %c0_14 = arith.constant 0 : index
    %45 = vector.load %arg2[%44, %c0_14] : memref<64x128xf32, #tpu.memory_space<vmem>>, vector<1x128xf32>
    %cst_15 = arith.constant 11.3137083 : f32
    %46 = vector.broadcast %cst_15 : f32 to vector<1x128xf32>
    %47 = arith.mulf %45, %46 : vector<1x128xf32>
    %c5 = arith.constant 5 : index
    %c0_16 = arith.constant 0 : index
    %48 = vector.load %arg3[%c5, %c0_16] : memref<16x128xf32, #tpu.memory_space<vmem>>, vector<1x128xf32>
    tpu.vector_store %arg3[%c5, %c0_16], %47 {strides = array<i32>} : memref<16x128xf32, #tpu.memory_space<vmem>>, vector<1x128xf32>,
    %c6_i32 = arith.constant 6 : i32
    %49 = arith.addi %0, %c6_i32 : i32
    %50 = arith.index_cast %49 : i32 to index
    %51 = memref.load %arg1[%50] : memref<16xi32, #tpu.memory_space<smem>>
    %52 = arith.index_cast %51 : i32 to index
    %c0_17 = arith.constant 0 : index
    %53 = vector.load %arg2[%52, %c0_17] : memref<64x128xf32, #tpu.memory_space<vmem>>, vector<1x128xf32>
    %cst_18 = arith.constant 11.3137083 : f32
    %54 = vector.broadcast %cst_18 : f32 to vector<1x128xf32>
    %55 = arith.mulf %53, %54 : vector<1x128xf32>
    %c6 = arith.constant 6 : index
    %c0_19 = arith.constant 0 : index
    %56 = vector.load %arg3[%c6, %c0_19] : memref<16x128xf32, #tpu.memory_space<vmem>>, vector<1x128xf32>
    tpu.vector_store %arg3[%c6, %c0_19], %55 {strides = array<i32>} : memref<16x128xf32, #tpu.memory_space<vmem>>, vector<1x128xf32>,
    %c7_i32 = arith.constant 7 : i32
    %57 = arith.addi %0, %c7_i32 : i32
    %58 = arith.index_cast %57 : i32 to index
    %59 = memref.load %arg1[%58] : memref<16xi32, #tpu.memory_space<smem>>
    %60 = arith.index_cast %59 : i32 to index
    %c0_20 = arith.constant 0 : index
    %61 = vector.load %arg2[%60, %c0_20] : memref<64x128xf32, #tpu.memory_space<vmem>>, vector<1x128xf32>
    %cst_21 = arith.constant 11.3137083 : f32
    %62 = vector.broadcast %cst_21 : f32 to vector<1x128xf32>
    %63 = arith.mulf %61, %62 : vector<1x128xf32>
    %c7 = arith.constant 7 : index
    %c0_22 = arith.constant 0 : index
    %64 = vector.load %arg3[%c7, %c0_22] : memref<16x128xf32, #tpu.memory_space<vmem>>, vector<1x128xf32>
    tpu.vector_store %arg3[%c7, %c0_22], %63 {strides = array<i32>} : memref<16x128xf32, #tpu.memory_space<vmem>>, vector<1x128xf32>,
    %c8_i32 = arith.constant 8 : i32
    %65 = arith.addi %0, %c8_i32 : i32
    %66 = arith.index_cast %65 : i32 to index
    %67 = memref.load %arg1[%66] : memref<16xi32, #tpu.memory_space<smem>>
    %68 = arith.index_cast %67 : i32 to index
    %c0_23 = arith.constant 0 : index
    %69 = vector.load %arg2[%68, %c0_23] : memref<64x128xf32, #tpu.memory_space<vmem>>, vector<1x128xf32>
    %cst_24 = arith.constant 11.3137083 : f32
    %70 = vector.broadcast %cst_24 : f32 to vector<1x128xf32>
    %71 = arith.mulf %69, %70 : vector<1x128xf32>
    %c8 = arith.constant 8 : index
    %c0_25 = arith.constant 0 : index
    %72 = vector.load %arg3[%c8, %c0_25] : memref<16x128xf32, #tpu.memory_space<vmem>>, vector<1x128xf32>
    tpu.vector_store %arg3[%c8, %c0_25], %71 {strides = array<i32>} : memref<16x128xf32, #tpu.memory_space<vmem>>, vector<1x128xf32>,
    %c9_i32 = arith.constant 9 : i32
    %73 = arith.addi %0, %c9_i32 : i32
    %74 = arith.index_cast %73 : i32 to index
    %75 = memref.load %arg1[%74] : memref<16xi32, #tpu.memory_space<smem>>
    %76 = arith.index_cast %75 : i32 to index
    %c0_26 = arith.constant 0 : index
    %77 = vector.load %arg2[%76, %c0_26] : memref<64x128xf32, #tpu.memory_space<vmem>>, vector<1x128xf32>
    %cst_27 = arith.constant 11.3137083 : f32
    %78 = vector.broadcast %cst_27 : f32 to vector<1x128xf32>
    %79 = arith.mulf %77, %78 : vector<1x128xf32>
    %c9 = arith.constant 9 : index
    %c0_28 = arith.constant 0 : index
    %80 = vector.load %arg3[%c9, %c0_28] : memref<16x128xf32, #tpu.memory_space<vmem>>, vector<1x128xf32>
    tpu.vector_store %arg3[%c9, %c0_28], %79 {strides = array<i32>} : memref<16x128xf32, #tpu.memory_space<vmem>>, vector<1x128xf32>,
    %c10_i32 = arith.constant 10 : i32
    %81 = arith.addi %0, %c10_i32 : i32
    %82 = arith.index_cast %81 : i32 to index
    %83 = memref.load %arg1[%82] : memref<16xi32, #tpu.memory_space<smem>>
    %84 = arith.index_cast %83 : i32 to index
    %c0_29 = arith.constant 0 : index
    %85 = vector.load %arg2[%84, %c0_29] : memref<64x128xf32, #tpu.memory_space<vmem>>, vector<1x128xf32>
    %cst_30 = arith.constant 11.3137083 : f32
    %86 = vector.broadcast %cst_30 : f32 to vector<1x128xf32>
    %87 = arith.mulf %85, %86 : vector<1x128xf32>
    %c10 = arith.constant 10 : index
    %c0_31 = arith.constant 0 : index
    %88 = vector.load %arg3[%c10, %c0_31] : memref<16x128xf32, #tpu.memory_space<vmem>>, vector<1x128xf32>
    tpu.vector_store %arg3[%c10, %c0_31], %87 {strides = array<i32>} : memref<16x128xf32, #tpu.memory_space<vmem>>, vector<1x128xf32>,
    %c11_i32 = arith.constant 11 : i32
    %89 = arith.addi %0, %c11_i32 : i32
    %90 = arith.index_cast %89 : i32 to index
    %91 = memref.load %arg1[%90] : memref<16xi32, #tpu.memory_space<smem>>
    %92 = arith.index_cast %91 : i32 to index
    %c0_32 = arith.constant 0 : index
    %93 = vector.load %arg2[%92, %c0_32] : memref<64x128xf32, #tpu.memory_space<vmem>>, vector<1x128xf32>
    %cst_33 = arith.constant 11.3137083 : f32
    %94 = vector.broadcast %cst_33 : f32 to vector<1x128xf32>
    %95 = arith.mulf %93, %94 : vector<1x128xf32>
    %c11 = arith.constant 11 : index
    %c0_34 = arith.constant 0 : index
    %96 = vector.load %arg3[%c11, %c0_34] : memref<16x128xf32, #tpu.memory_space<vmem>>, vector<1x128xf32>
    tpu.vector_store %arg3[%c11, %c0_34], %95 {strides = array<i32>} : memref<16x128xf32, #tpu.memory_space<vmem>>, vector<1x128xf32>,
    %c12_i32 = arith.constant 12 : i32
    %97 = arith.addi %0, %c12_i32 : i32
    %98 = arith.index_cast %97 : i32 to index
    %99 = memref.load %arg1[%98] : memref<16xi32, #tpu.memory_space<smem>>
    %100 = arith.index_cast %99 : i32 to index
    %c0_35 = arith.constant 0 : index
    %101 = vector.load %arg2[%100, %c0_35] : memref<64x128xf32, #tpu.memory_space<vmem>>, vector<1x128xf32>
    %cst_36 = arith.constant 11.3137083 : f32
    %102 = vector.broadcast %cst_36 : f32 to vector<1x128xf32>
    %103 = arith.mulf %101, %102 : vector<1x128xf32>
    %c12 = arith.constant 12 : index
    %c0_37 = arith.constant 0 : index
    %104 = vector.load %arg3[%c12, %c0_37] : memref<16x128xf32, #tpu.memory_space<vmem>>, vector<1x128xf32>
    tpu.vector_store %arg3[%c12, %c0_37], %103 {strides = array<i32>} : memref<16x128xf32, #tpu.memory_space<vmem>>, vector<1x128xf32>,
    %c13_i32 = arith.constant 13 : i32
    %105 = arith.addi %0, %c13_i32 : i32
    %106 = arith.index_cast %105 : i32 to index
    %107 = memref.load %arg1[%106] : memref<16xi32, #tpu.memory_space<smem>>
    %108 = arith.index_cast %107 : i32 to index
    %c0_38 = arith.constant 0 : index
    %109 = vector.load %arg2[%108, %c0_38] : memref<64x128xf32, #tpu.memory_space<vmem>>, vector<1x128xf32>
    %cst_39 = arith.constant 11.3137083 : f32
    %110 = vector.broadcast %cst_39 : f32 to vector<1x128xf32>
    %111 = arith.mulf %109, %110 : vector<1x128xf32>
    %c13 = arith.constant 13 : index
    %c0_40 = arith.constant 0 : index
    %112 = vector.load %arg3[%c13, %c0_40] : memref<16x128xf32, #tpu.memory_space<vmem>>, vector<1x128xf32>
    tpu.vector_store %arg3[%c13, %c0_40], %111 {strides = array<i32>} : memref<16x128xf32, #tpu.memory_space<vmem>>, vector<1x128xf32>,
    %c14_i32 = arith.constant 14 : i32
    %113 = arith.addi %0, %c14_i32 : i32
    %114 = arith.index_cast %113 : i32 to index
    %115 = memref.load %arg1[%114] : memref<16xi32, #tpu.memory_space<smem>>
    %116 = arith.index_cast %115 : i32 to index
    %c0_41 = arith.constant 0 : index
    %117 = vector.load %arg2[%116, %c0_41] : memref<64x128xf32, #tpu.memory_space<vmem>>, vector<1x128xf32>
    %cst_42 = arith.constant 11.3137083 : f32
    %118 = vector.broadcast %cst_42 : f32 to vector<1x128xf32>
    %119 = arith.mulf %117, %118 : vector<1x128xf32>
    %c14 = arith.constant 14 : index
    %c0_43 = arith.constant 0 : index
    %120 = vector.load %arg3[%c14, %c0_43] : memref<16x128xf32, #tpu.memory_space<vmem>>, vector<1x128xf32>
    tpu.vector_store %arg3[%c14, %c0_43], %119 {strides = array<i32>} : memref<16x128xf32, #tpu.memory_space<vmem>>, vector<1x128xf32>,
    %c15_i32 = arith.constant 15 : i32
    %121 = arith.addi %0, %c15_i32 : i32
    %122 = arith.index_cast %121 : i32 to index
    %123 = memref.load %arg1[%122] : memref<16xi32, #tpu.memory_space<smem>>
    %124 = arith.index_cast %123 : i32 to index
    %c0_44 = arith.constant 0 : index
    %125 = vector.load %arg2[%124, %c0_44] : memref<64x128xf32, #tpu.memory_space<vmem>>, vector<1x128xf32>
    %cst_45 = arith.constant 11.3137083 : f32
    %126 = vector.broadcast %cst_45 : f32 to vector<1x128xf32>
    %127 = arith.mulf %125, %126 : vector<1x128xf32>
    %c15 = arith.constant 15 : index
    %c0_46 = arith.constant 0 : index
    %128 = vector.load %arg3[%c15, %c0_46] : memref<16x128xf32, #tpu.memory_space<vmem>>, vector<1x128xf32>
    tpu.vector_store %arg3[%c15, %c0_46], %127 {strides = array<i32>} : memref<16x128xf32, #tpu.memory_space<vmem>>, vector<1x128xf32>,
    return
  }
  func.func @transform_0(%arg0: i32, %arg1: memref<16xi32, #tpu.memory_space<smem>>) -> (i32, i32) {
    %c0_i32 = arith.constant 0 : i32
    %c0_i32_0 = arith.constant 0 : i32
    %c0_i32_1 = arith.constant 0 : i32
    return %c0_i32, %c0_i32_0 : i32, i32
  }
  func.func @transform_1(%arg0: i32, %arg1: memref<16xi32, #tpu.memory_space<smem>>) -> (i32, i32) {
    %c0_i32 = arith.constant 0 : i32
    %c0_i32_0 = arith.constant 0 : i32
    return %arg0, %c0_i32 : i32, i32
  }
}

</mosaic_0001>

<bundles_post_ra>
// kernel: tpu_custom_call.1
= control target key start
LH: loop header
LB: loop body
LE: loop exit
PB: predicated region body
PF: predicated region fallthrough
CT: control target
= control target key end

     0   :  { %s251_s12 = smov [#allocation3]   ;;  %s292_s0 = inlined_call_operand.hbm [shape: s32[16], index: 0, kind: input, shape index: {}]   ;;  %s293_s1 = inlined_call_operand.hbm [shape: f32[64,128], index: 1, kind: input, shape index: {}]   ;;  %s294_s2 = inlined_call_operand.hbm [shape: f32[16,128], index: 2, kind: output, shape index: {}]  }
   0x1   :  { %s8_s11 = sshll.u32 %s292_s0, 4  ;;  %s9_s11 = int_to_ptr.hbm [resolvable:$true] %s8_s11 }
   0x2   :  { %11 = dma.hbm_to_smem %s9_s11, 16, %s251_s12, [#allocation2] }
   0x3   :  { %245 = dma.done.wait [#allocation2], 16 }
   0x4   :  { %246 = vsyncadd [#allocation2], 4294967280 }
   0x5   :  { %14 = sfence }
   0x6   :  { %15 = vsyncpa [#allocation5], 0 }
   0x7   :  { %16 = vsyncpa [#allocation6], 0  ;;  %s21_s15 = sshll.u32 %s293_s1, 4  ;;  %s252_s16 = smov [#allocation4]   ;;  %s22_s15 = int_to_ptr.hbm [resolvable:$true] %s21_s15 }
   0x8   :  { %s23_s17 = sshll.u32 %s252_s16, 4  ;;  %s253_s18 = smov 128   ;;  %s24_s17 = int_to_ptr.vmem [resolvable:$true] %s23_s17 }
   0x9   :  { %s254_s19 = smov 8  }
   0xa   :  { %29 = dma.hbm_to_vmem [thread:$0]  %s22_s15, 1024, %s24_s17, [#allocation5], %s253_s18, %s253_s18, %s254_s19  }
   0xb   :  { %247 = dma.done.wait [#allocation5], 1024  }
   0xc   :  { %248 = vsyncadd [#allocation5], 4294966272  ;;  %s35_s0 = sld [smem:[#allocation3]] }
   0xd   :  { %s165_s20 = sld [smem:[#allocation3 + $0x1]] }
   0xe   :  { %s166_s21 = sld [smem:[#allocation3 + $0x2]] }
   0xf   :  { %s167_s22 = sld [smem:[#allocation3 + $0x3]] }
  0x10   :  { %s168_s23 = sld [smem:[#allocation3 + $0x4]] }
  0x11   :  { %s169_s24 = sld [smem:[#allocation3 + $0x5]] }
  0x12   :  { %s170_s25 = sld [smem:[#allocation3 + $0x6]]  ;;  %s36_s1 = scalar_lea.vmem [#allocation4], %s35_s0 }
  0x13   :  { %v37_v0 = vld [vmem:[%s36_s1] sm:$0x1]  ;;  %s171_s26 = sld [smem:[#allocation3 + $0x7]]  ;;  %s42_s27 = scalar_lea.vmem [#allocation4], %s165_s20 }
  0x14   :  { %v38_v1 = vmul.f32 11.313708, %v37_v0  ;;  %v43_v2 = vld [vmem:[%s42_s27] sm:$0x1]  ;;  %s48_s28 = scalar_lea.vmem [#allocation4], %s166_s21  ;;  %s172_s6 = sld [smem:[#allocation3 + $0x8]] }
  0x15   :  { %v44_v3 = vmul.f32 11.313708, %v43_v2  ;;  %v49_v4 = vld [vmem:[%s48_s28] sm:$0x1]  ;;  %s54_s29 = scalar_lea.vmem [#allocation4], %s167_s22  ;;  %s173_s7 = sld [smem:[#allocation3 + $0x9]] }
  0x16   :  { %39 = vst [vmem:[#allocation7] sm:$0x1] %v38_v1  ;;  %v50_v5 = vmul.f32 11.313708, %v49_v4  ;;  %v55_v6 = vld [vmem:[%s54_s29] sm:$0x1] }
  0x17   :  { %45 = vst [vmem:[#allocation7 + $0x1] sm:$0x1] %v44_v3  ;;  %v56_v7 = vmul.f32 11.313708, %v55_v6  ;;  %s60_s30 = scalar_lea.vmem [#allocation4], %s168_s23  ;;  %s66_s3 = scalar_lea.vmem [#allocation4], %s169_s24 }
  0x18   :  { %51 = vst [vmem:[#allocation7 + $0x2] sm:$0x1] %v50_v5  ;;  %v61_v8 = vld [vmem:[%s60_s30] sm:$0x1]  ;;  %s72_s4 = scalar_lea.vmem [#allocation4], %s170_s25  ;;  %s174_s8 = sld [smem:[#allocation3 + $0xa]] }
  0x19   :  { %v67_v9 = vld [vmem:[%s66_s3] sm:$0x1]  ;;  %57 = vst [vmem:[#allocation7 + $0x3] sm:$0x1] %v56_v7  ;;  %v62_v10 = vmul.f32 11.313708, %v61_v8 }
  0x1a   :  { %v68_v11 = vmul.f32 11.313708, %v67_v9  ;;  %v73_v12 = vld [vmem:[%s72_s4] sm:$0x1]  ;;  %s78_s5 = scalar_lea.vmem [#allocation4], %s171_s26  ;;  %s175_s9 = sld [smem:[#allocation3 + $0xb]] }
  0x1b   :  { %63 = vst [vmem:[#allocation7 + $0x4] sm:$0x1] %v62_v10  ;;  %v79_v13 = vld [vmem:[%s78_s5] sm:$0x1]  ;;  %v74_v14 = vmul.f32 11.313708, %v73_v12 }
  0x1c   :  { %69 = vst [vmem:[#allocation7 + $0x5] sm:$0x1] %v68_v11  ;;  %v80_v15 = vmul.f32 11.313708, %v79_v13  ;;  %s176_s10 = sld [smem:[#allocation3 + $0xc]]  ;;  %s84_s13 = scalar_lea.vmem [#allocation4], %s172_s6 }
  0x1d   :  { %75 = vst [vmem:[#allocation7 + $0x6] sm:$0x1] %v74_v14  ;;  %s177_s11 = sld [smem:[#allocation3 + $0xd]]  ;;  %v85_v16 = vld [vmem:[%s84_s13] sm:$0x1]  ;;  %s90_s15 = scalar_lea.vmem [#allocation4], %s173_s7 }
  0x1e   :  { %81 = vst [vmem:[#allocation7 + $0x7] sm:$0x1] %v80_v15  ;;  %s280_s12 = sld [smem:[#allocation3 + $0xe]]  ;;  %v86_v17 = vmul.f32 11.313708, %v85_v16  ;;  %s136_s0 = sshll.u32 %s294_s2, 4  ;;  %s137_s0 = int_to_ptr.hbm [resolvable:$true] %s136_s0 }
  0x1f   :  { %s179_s14 = sld [smem:[#allocation3 + $0xf]]  ;;  %v91_v18 = vld [vmem:[%s90_s15] sm:$0x1]  ;;  %s96_s20 = scalar_lea.vmem [#allocation4], %s174_s8 }
  0x20   :  { %v92_v19 = vmul.f32 11.313708, %v91_v18  ;;  %v97_v20 = vld [vmem:[%s96_s20] sm:$0x1]  ;;  %s255_s21 = smov [#allocation7]   ;;  %s102_s23 = scalar_lea.vmem [#allocation4], %s175_s9 }
  0x21   :  { %s285_s22 = sshll.u32 %s255_s21, 4  ;;  %87 = vst [vmem:[#allocation7 + $0x8] sm:$0x1] %v86_v17  ;;  %v98_v21 = vmul.f32 11.313708, %v97_v20  ;;  %s135_s22 = int_to_ptr.vmem [resolvable:$true] %s285_s22 }
  0x22   :  { %v103_v22 = vld [vmem:[%s102_s23] sm:$0x1]  ;;  %93 = vst [vmem:[#allocation7 + $0x9] sm:$0x1] %v92_v19  ;;  %s108_s24 = scalar_lea.vmem [#allocation4], %s176_s10 }
  0x23   :  { %v104_v23 = vmul.f32 11.313708, %v103_v22  ;;  %99 = vst [vmem:[#allocation7 + $0xa] sm:$0x1] %v98_v21  ;;  %v109_v24 = vld [vmem:[%s108_s24] sm:$0x1] }
  0x24   :  { %s114_s25 = scalar_lea.vmem [#allocation4], %s177_s11  ;;  %v110_v26 = vmul.f32 11.313708, %v109_v24  ;;  %s120_s2 = scalar_lea.vmem [#allocation4], %s280_s12 }
  0x25   :  { %v115_v25 = vld [vmem:[%s114_s25] sm:$0x1]  ;;  %105 = vst [vmem:[#allocation7 + $0xb] sm:$0x1] %v104_v23  ;;  %s126_s1 = scalar_lea.vmem [#allocation4], %s179_s14 }
  0x26   :  { %v116_v27 = vmul.f32 11.313708, %v115_v25  ;;  %111 = vst [vmem:[#allocation7 + $0xc] sm:$0x1] %v110_v26  ;;  %v121_v28 = vld [vmem:[%s120_s2] sm:$0x1] }
  0x27   :  { %v127_v29 = vld [vmem:[%s126_s1] sm:$0x1]  ;;  %v122_v30 = vmul.f32 11.313708, %v121_v28 }
  0x28   :  { %117 = vst [vmem:[#allocation7 + $0xd] sm:$0x1] %v116_v27  ;;  %v128_v31 = vmul.f32 11.313708, %v127_v29 }
  0x29   :  { %123 = vst [vmem:[#allocation7 + $0xe] sm:$0x1] %v122_v30 }
  0x2a   :  { %129 = vst [vmem:[#allocation7 + $0xf] sm:$0x1] %v128_v31 }
  0x2b   :  { %142 = dma.vmem_to_hbm [thread:$0]  %s135_s22, 256, %s137_s0, [#allocation6], %s253_s18, %s253_s18, %s254_s19  }
  0x2c   :  { %249 = dma.done.wait [#allocation6], 256  }
  0x2d   :  { %250 = vsyncadd [#allocation6], 4294967040 }
  0x2e   :  { %147 = vsyncpa [#allocation5], 1 }
  0x2f   :  { %148 = vsyncpa [#allocation6], 1 }

</bundles_post_ra>
